<compile_context>
chip_gen: v6e
topology: v6e:2x2x1
jax: 0.10.0
libtpu: 0.0.40
codegen_flags: <defaults>
</compile_context>

<pallas_src>
import functools

import jax
import jax.numpy as jnp
from jax import lax
from jax.experimental import pallas as pl
from jax.experimental.pallas import tpu as pltpu

C = 32          # CHANNELS
G_TAPS = 8      # conv taps per MXU matmul (contraction = G_TAPS * C = 256)

# Receptive-field half-width of the residual stack: 8 units K=11, 4 units K=21,
# 4 units K=41, two convs each; the K=1 (initial/skip/dilated/final) convs add 0.
_LAYER_KS = ((11, 8), (21, 4), (41, 4))
_RF_HALF = sum(n * 2 * (k // 2) for k, n in _LAYER_KS)            # = 320
HALO = 384                                                        # mult of 128
assert HALO >= _RF_HALF and HALO % 128 == 0, (HALO, _RF_HALF)

_PARAM_ORDER = ("w11", "b11", "bn11", "w21", "b21", "bn21", "w41", "b41",
                "bn41", "dil_w", "dil_b", "init_w", "init_b", "skip_w",
                "skip_b", "fin_w", "fin_b")


def _gelu(v):
    # Exact (erf-based) GELU matching torch.nn.GELU(); erf via the
    # Abramowitz-Stegun 7.1.26 polynomial (|err| < 1.5e-7).  Used by BOTH the
    # kernel and the pure-JAX reference so the two stay bit-consistent.
    z = v * 0.7071067811865476
    s = jnp.sign(z)
    a = jnp.abs(z)
    t = 1.0 / (1.0 + 0.3275911 * a)
    poly = t * (0.254829592 + t * (-0.284496736 + t * (1.421413741
               + t * (-1.453152027 + t * 1.061405429))))
    erf = s * (1.0 - poly * jnp.exp(-a * a))
    return 0.5 * v * (1.0 + erf)


# --------------------- one-time pltpu.roll direction probe --------------------

def _roll_probe_kernel(x_ref, o_ref):
    o_ref[...] = pltpu.roll(x_ref[...], 1, 1)


_ROLL_LIKE_JNP = None


def _roll_like_jnp():
    """True iff pltpu.roll matches jnp.roll (out[i] == in[(i - shift) % n])."""
    global _ROLL_LIKE_JNP
    if _ROLL_LIKE_JNP is None:
        x = jnp.broadcast_to(jnp.arange(128, dtype=jnp.float32), (8, 128))
        y = pl.pallas_call(
            _roll_probe_kernel,
            out_shape=jax.ShapeDtypeStruct((8, 128), jnp.float32))(x)
        _ROLL_LIKE_JNP = bool(y[0, 0] == 127.0)
    return _ROLL_LIKE_JNP


# --------------------------------- kernel -------------------------------------

def _osai_kernel(x_ref, w11_ref, b11_ref, bn11_ref, w21_ref, b21_ref, bn21_ref,
                 w41_ref, b41_ref, bn41_ref, dilw_ref, dilb_ref,
                 initw_ref, initb_ref, skipw_ref, skipb_ref,
                 finw_ref, finb_ref, out_ref, *, L, T, H, W, roll_like_jnp):
    f32, bf16 = jnp.float32, jnp.bfloat16

    # Global sequence position of each lane of this window; conv inputs are
    # zeroed outside [0, L), reproducing Conv1d's zero padding at the true
    # sequence boundaries.
    base = pl.program_id(1) * T - H
    gpos = lax.broadcasted_iota(jnp.int32, (1, W), 1) + base
    valid = (gpos >= 0) & (gpos < L)

    def mmf(wb, act):                       # bf16 x bf16 -> f32 accumulation
        return jnp.dot(wb, act.astype(bf16), preferred_element_type=f32)

    def shift_lanes(a16, d):
        # v[:, i] = a16[:, i + d] (circular; HALO >= receptive half-width, so
        # wrapped lanes never reach a valid output's dependency cone).
        if d == 0:
            return a16
        s = (-d) % W if roll_like_jnp else d % W
        return pltpu.roll(a16, s, 1)

    def conv_same(act, wp, bias, K):
        # act:  (C, W) f32 conv input, already masked outside the sequence.
        # wp:   (C, K*C) bf16 with wp[co, k*C + ci] = W[co, ci, k].
        # bias: (C, 1) f32.
        act16 = act.astype(bf16)            # single cast; all rolls are bf16
        pad = K // 2
        acc = None
        for g0 in range(0, K, G_TAPS):      # static loop over tap groups
            r = min(G_TAPS, K - g0)
            parts = [shift_lanes(act16, g0 + j - pad) for j in range(r)]
            block = parts[0] if r == 1 else jnp.concatenate(parts, axis=0)
            part = jnp.dot(wp[:, g0 * C:(g0 + r) * C], block,
                           preferred_element_type=f32)
            acc = part if acc is None else acc + part
        return acc + bias

    def res_group(h, w_ref, b_ref, bn_ref, K, start, count):
        # The 4-unit loop stays rolled to bound Mosaic program size at large
        # tile widths; each iteration is several large matmuls, so loop
        # overhead is negligible.
        def body(i, hh):
            u = start + i
            bn = bn_ref[u]                  # (4, C, 1) = [s1, t1, s2, t2]
            a = jnp.where(valid, _gelu(hh * bn[0] + bn[1]), 0.0)
            y = conv_same(a, w_ref[2 * u], b_ref[2 * u], K)
            a = jnp.where(valid, _gelu(y * bn[2] + bn[3]), 0.0)
            y = conv_same(a, w_ref[2 * u + 1], b_ref[2 * u + 1], K)
            return hh + y
        return lax.fori_loop(0, count, body, h)

    def dil_unit(h, i):
        # DilatedConvolutionalUnit: kernel_size=1, so dilation is irrelevant.
        return h + mmf(dilw_ref[i], h) + dilb_ref[i]

    xin = x_ref[0, 0]                                      # (4, W) one-hot DNA
    x0 = mmf(initw_ref[...], xin) + initb_ref[...]         # initial_conv -> (C, W)
    h = x0 + mmf(skipw_ref[...], x0) + skipb_ref[...]      # x0 + initial_skip(x0)

    h = res_group(h, w11_ref, b11_ref, bn11_ref, 11, 0, 4)   # units 0-3   (K=11)
    h = dil_unit(h, 0)                                       # unit 4
    h = res_group(h, w11_ref, b11_ref, bn11_ref, 11, 4, 4)   # units 5-8   (K=11)
    h = dil_unit(h, 1)                                       # unit 9
    h = res_group(h, w21_ref, b21_ref, bn21_ref, 21, 0, 4)   # units 10-13 (K=21)
    h = dil_unit(h, 2)                                       # unit 14
    h = res_group(h, w41_ref, b41_ref, bn41_ref, 41, 0, 4)   # units 15-18 (K=41)
    h = dil_unit(h, 3)                                       # unit 19

    hc = h[:, H:H + T]                                     # central (owned) lanes
    logits = mmf(finw_ref[...], hc) + finb_ref[...]        # final_conv -> (3, T)
    m = jnp.max(logits, axis=0, keepdims=True)             # softmax over channels
    e = jnp.exp(logits - m)
    out_ref[0] = (e / jnp.sum(e, axis=0, keepdims=True)).astype(out_ref.dtype)


def osai_forward(x, packed, l_tile=8192):
    N, Cin, L = x.shape
    assert Cin == 4 and L % 128 == 0
    T = min(l_tile, L)                       # per-grid-step output tile (lanes)
    num_t = pl.cdiv(L, T)
    L_pad = num_t * T
    W = T + 2 * HALO                         # window processed by the kernel

    # Host-side windowing: pad with HALO zeros on both sides and gather the
    # overlapping (4, W) windows (bf16: one-hot values are exact) so the
    # kernel's working set is O(W), not O(L).
    # TODO(synk): replace with in-kernel DMA from a pl.ANY HBM ref to avoid
    #             materializing the gathered copy for genomic-scale L.
    x_pad = jnp.zeros((N, 4, L_pad + 2 * HALO), jnp.bfloat16)
    x_pad = x_pad.at[:, :, HALO:HALO + L].set(x.astype(jnp.bfloat16))
    idx = (jnp.arange(num_t) * T)[:, None] + jnp.arange(W)[None, :]
    x_win = jnp.transpose(jnp.take(x_pad, idx, axis=2), (0, 2, 1, 3))  # (N,num_t,4,W)

    args = [packed[name] for name in _PARAM_ORDER]
    in_specs = [pl.BlockSpec((1, 1, 4, W), lambda n, t: (n, t, 0, 0))]
    for a in args:   # parameters: one full-array block, identical every grid step
        in_specs.append(pl.BlockSpec(a.shape, lambda n, t, nd=a.ndim: (0,) * nd))

    out = pl.pallas_call(
        functools.partial(_osai_kernel, L=L, T=T, H=HALO, W=W,
                          roll_like_jnp=_roll_like_jnp()),
        out_shape=jax.ShapeDtypeStruct((N, 3, L_pad), jnp.float32),
        grid=(N, num_t),
        in_specs=in_specs,
        out_specs=pl.BlockSpec((1, 3, T), lambda n, t: (n, 0, t)),
        compiler_params=pltpu.CompilerParams(
            dimension_semantics=("parallel", "parallel"),
            # 56 MiB: below v7x's 64 MiB physical VMEM, ample for v5e/v6e; the
            # T=8192 working set is ~< 25 MiB (dominant temp: (256, W) bf16).
            vmem_limit_bytes=56 * 1024 * 1024),
    )(x_win, *args)
    return out[:, :, :L] if L_pad != L else out


# ----------------------- parameters (deterministic init) ----------------------

def init_params(key):
    """Random test parameters, scaled so activations / logits stay O(1).

    With unscaled random weights, the 20-unit residual stack amplifies bf16
    rounding differences between any two valid conv formulations into visible
    softmax deltas (v2's failure) -- a property of the init, not the kernel.
    """
    it = iter(jax.random.split(key, 40))

    def normal(shape, scale):
        return scale * jax.random.normal(next(it), shape, jnp.float32)

    def conv_group(n, K):                       # n ResidualUnits, kernel size K
        w = normal((n, 2, C, C, K), 0.5 * (C * K) ** -0.5)
        b = normal((n, 2, C), 0.02)
        return w, b

    def bn_group(n):                            # eval-mode BN folded to affine
        gamma = 1.0 + 0.1 * jax.random.normal(next(it), (n, 2, C), jnp.float32)
        beta = 0.1 * jax.random.normal(next(it), (n, 2, C), jnp.float32)
        mean = 0.1 * jax.random.normal(next(it), (n, 2, C), jnp.float32)
        var = jax.random.uniform(next(it), (n, 2, C), jnp.float32, 0.5, 1.5)
        scale = gamma * lax.rsqrt(var + 1e-5)
        shift = beta - mean * scale
        return jnp.stack([scale[:, 0], shift[:, 0], scale[:, 1], shift[:, 1]], axis=1)

    w11, b11 = conv_group(8, 11)
    bn11 = bn_group(8)
    w21, b21 = conv_group(4, 21)
    bn21 = bn_group(4)
    w41, b41 = conv_group(4, 41)
    bn41 = bn_group(4)
    return dict(
        init_w=normal((C, 4), 0.5), init_b=normal((C,), 0.02),
        skip_w=normal((C, C), C ** -0.5), skip_b=normal((C,), 0.02),
        w11=w11, b11=b11, bn11=bn11,
        w21=w21, b21=b21, bn21=bn21,
        w41=w41, b41=b41, bn41=bn41,
        dil_w=normal((4, C, C), 0.3 * C ** -0.5), dil_b=normal((4, C), 0.02),
        fin_w=normal((3, C), C ** -0.5), fin_b=normal((3,), 0.02),
    )


def pack_params(nat):
    bf16 = jnp.bfloat16

    def pack_w(w):  # (n, 2, Co, Ci, K) -> (2n, Co, K*Ci) bf16, index = 2*u + conv
        n, two, Co, Ci, K = w.shape
        return (jnp.transpose(w, (0, 1, 2, 4, 3))
                .reshape(n * two, Co, K * Ci).astype(bf16))

    def pack_b(b):  # (n, 2, C) -> (2n, C, 1) f32
        n, two, Co = b.shape
        return b.reshape(n * two, Co, 1)

    return dict(
        w11=pack_w(nat["w11"]), b11=pack_b(nat["b11"]), bn11=nat["bn11"][..., None],
        w21=pack_w(nat["w21"]), b21=pack_b(nat["b21"]), bn21=nat["bn21"][..., None],
        w41=pack_w(nat["w41"]), b41=pack_b(nat["b41"]), bn41=nat["bn41"][..., None],
        dil_w=nat["dil_w"].astype(bf16), dil_b=nat["dil_b"][..., None],
        init_w=nat["init_w"].astype(bf16), init_b=nat["init_b"][:, None],
        skip_w=nat["skip_w"].astype(bf16), skip_b=nat["skip_b"][:, None],
        fin_w=nat["fin_w"].astype(bf16), fin_b=nat["fin_b"][:, None],
    )


# ----------------------- pure-JAX reference (for verification) ----------------
# Mirrors the kernel's quantization: bf16 matmul operands, f32 accumulation,
# f32 biases / BN / activations, and the identical _gelu formulation.

def ref_forward(x, nat):
    bf16 = jnp.bfloat16

    def conv1d(h, w, b):
        K = w.shape[-1]
        y = lax.conv_general_dilated(h.astype(bf16), w.astype(bf16),
                                     window_strides=(1,),
                                     padding=[(K // 2, K // 2)],
                                     dimension_numbers=("NCH", "OIH", "NCH"),
                                     preferred_element_type=jnp.float32)
        return y + b[None, :, None]

    bn = lambda h, s, t: h * s[None, :, None] + t[None, :, None]

    def res_unit(h, w, b, bns):
        y = conv1d(_gelu(bn(h, bns[0], bns[1])), w[0], b[0])
        y = conv1d(_gelu(bn(y, bns[2], bns[3])), w[1], b[1])
        return h + y

    def dil_unit(h, w, b):
        return h + conv1d(h, w[:, :, None], b)

    x0 = conv1d(x, nat["init_w"][:, :, None], nat["init_b"])
    h = x0 + conv1d(x0, nat["skip_w"][:, :, None], nat["skip_b"])
    for u in range(4):
        h = res_unit(h, nat["w11"][u], nat["b11"][u], nat["bn11"][u])
    h = dil_unit(h, nat["dil_w"][0], nat["dil_b"][0])
    for u in range(4, 8):
        h = res_unit(h, nat["w11"][u], nat["b11"][u], nat["bn11"][u])
    h = dil_unit(h, nat["dil_w"][1], nat["dil_b"][1])
    for u in range(4):
        h = res_unit(h, nat["w21"][u], nat["b21"][u], nat["bn21"][u])
    h = dil_unit(h, nat["dil_w"][2], nat["dil_b"][2])
    for u in range(4):
        h = res_unit(h, nat["w41"][u], nat["b41"][u], nat["bn41"][u])
    h = dil_unit(h, nat["dil_w"][3], nat["dil_b"][3])
    logits = conv1d(h, nat["fin_w"][:, :, None], nat["fin_b"])
    return jax.nn.softmax(logits, axis=1)


if __name__ == "__main__":
    key = jax.random.PRNGKey(0)
    kx, kp, kx2 = jax.random.split(key, 3)
    nat = init_params(kp)
    packed = pack_params(nat)

    # --- single-tile check (whole sequence fits one window) ---
    N, L = 2, 256
    x = jax.nn.one_hot(jax.random.randint(kx, (N, L), 0, 4), 4, axis=1,
                       dtype=jnp.float32)                  # (N, 4, L) one-hot DNA
    out = jax.block_until_ready(osai_forward(x, packed))
    assert out.shape == (N, 3, L) and out.dtype == jnp.float32
    ref = ref_forward(x, nat)
    err = float(jnp.max(jnp.abs(out - ref)))
    assert bool(jnp.all(jnp.abs(jnp.sum(out, axis=1) - 1.0) < 1e-5))
    assert err < 5e-3, f"single-tile max abs diff vs reference = {err}"

    # --- multi-tile check (exercises the halo / overlapping-window path) ---
    L2 = 512
    x2 = jax.nn.one_hot(jax.random.randint(kx2, (N, L2), 0, 4), 4, axis=1,
                        dtype=jnp.float32)
    out2 = jax.block_until_ready(osai_forward(x2, packed, l_tile=128))
    err2 = float(jnp.max(jnp.abs(out2 - ref_forward(x2, nat))))
    assert err2 < 5e-3, f"multi-tile max abs diff vs reference = {err2}"

    print("KERNEL_OK")
</pallas_src>

<mosaic_0001>
module attributes {stable_mosaic.version = 11 : i64} {
  func.func @_roll_probe_kernel(%arg0: memref<8x128xf32, #tpu.memory_space<vmem>>, %arg1: memref<8x128xf32, #tpu.memory_space<vmem>>) attributes {dimension_semantics = [], scalar_prefetch = 0 : i64, scratch_operands = 0 : i64, tpu.core_type = #tpu.core_type<tc>} {
    %c0 = arith.constant 0 : index
    %c0_0 = arith.constant 0 : index
    %0 = vector.load %arg0[%c0, %c0_0] : memref<8x128xf32, #tpu.memory_space<vmem>>, vector<8x128xf32>
    %c1_i32 = arith.constant 1 : i32
    %1 = tpu.dynamic_rotate %0 by %c1_i32 dim 1 : vector<8x128xf32>, i32 -> vector<8x128xf32>
    %c0_1 = arith.constant 0 : index
    %c0_2 = arith.constant 0 : index
    %2 = vector.load %arg1[%c0_1, %c0_2] : memref<8x128xf32, #tpu.memory_space<vmem>>, vector<8x128xf32>
    tpu.vector_store %arg1[%c0_1, %c0_2], %1 {strides = array<i32>} : memref<8x128xf32, #tpu.memory_space<vmem>>, vector<8x128xf32>,
    return
  }
}

</mosaic_0001>

<bundles_post_ra>
// kernel: tpu_custom_call.1
= control target key start
LH: loop header
LB: loop body
LE: loop exit
PB: predicated region body
PF: predicated region fallthrough
CT: control target
= control target key end

     0   :  { %6 = vsyncpa [#allocation3], 0  ;;  %s106_s0 = inlined_call_operand.hbm [shape: f32[8,128], index: 0, kind: input, shape index: {}]   ;;  %s107_s1 = inlined_call_operand.hbm [shape: f32[8,128], index: 1, kind: output, shape index: {}]  }
   0x1   :  { %7 = vsyncpa [#allocation4], 0  ;;  %s87_s6 = smov [#allocation2]  }
   0x2   :  { %s14_s7 = sshll.u32 %s87_s6, 4  ;;  %s15_s7 = int_to_ptr.vmem [resolvable:$true] %s14_s7 }
   0x3   :  { %s51_s8 = scalar_lea.vmem %s15_s7, 128  ;;  %p56_p1 = scmp.lt.s32.totalorder %s15_s7, %s15_s7 }
   0x4   :  { %p52_p0 = scmp.ne.s32.totalorder %s15_s7, %s51_s8  ;;  %p57_p2 = scmp.lt.s32.totalorder %s51_s8, %s51_s8 }
   0x6   :  { %p58_p3 = por %p57_p2, %p56_p1 }
   0x8   :  { %p59_p4 = pnand %p58_p3, %p52_p0 }
   0xa   :  { %62 = shalt.err (!%p59_p4)
}
   0xb   :  { %17 = dma.hbm_to_vmem [thread:$0]  %s106_s0, 128, %s15_s7, [#allocation3]  }
   0xc   :  { %83 = dma.done.wait [#allocation3], 128  }
   0xd   :  { %84 = vsyncadd [#allocation3], 4294967168  ;;  %v21_v0 = vld [vmem:[#allocation2] sm:$0xff]  ;;  %s88_s11 = smov 1   ;;  %s89_s12 = smov [#allocation5]  }
   0xe   :  { %22 = vrot.lane.b32.xlu0 %v21_v0, %s88_s11  ;;  %s31_s13 = sshll.u32 %s89_s12, 4  ;;  %s32_s13 = int_to_ptr.vmem [resolvable:$true] %s31_s13 }
   0xf   :  { %s63_s14 = scalar_lea.vmem %s32_s13, 128  ;;  %p68_p6 = scmp.lt.s32.totalorder %s32_s13, %s32_s13 }
  0x10   :  { %p64_p5 = scmp.ne.s32.totalorder %s32_s13, %s63_s14  ;;  %p69_p7 = scmp.lt.s32.totalorder %s63_s14, %s63_s14 }
  0x12   :  { %p70_p8 = por %p69_p7, %p68_p6 }
  0x14   :  { %p71_p9 = pnand %p70_p8, %p64_p5 }
  0x80   :  { %v23_v1 = vpop.permute.xlu0 %22 }
  0x81   :  { %24 = vst [vmem:[#allocation5] sm:$0xff] %v23_v1 }
  0x82   :  { %74 = shalt.err (!%p71_p9)
}
  0x83   :  { %34 = dma.vmem_to_hbm [thread:$0]  %s32_s13, 128, %s107_s1, [#allocation4]  }
  0x84   :  { %85 = dma.done.wait [#allocation4], 128  }
  0x85   :  { %86 = vsyncadd [#allocation4], 4294967168 }
  0x86   :  { %38 = vsyncpa [#allocation3], 1 }
  0x87   :  { %39 = vsyncpa [#allocation4], 1 }

</bundles_post_ra>
